<compile_context>
chip_gen: v7x
topology: tpu7x:2x2x1
jax: 0.10.0
libtpu: 0.0.40
codegen_flags: <defaults>
</compile_context>

<pallas_src>
import functools

import jax
import jax.numpy as jnp
from jax.experimental import pallas as pl
from jax.experimental.pallas import tpu as pltpu


def _selective_gate_kernel(x_ref, wt_ref, b_ref, o_ref, acc_ref, *, ts, s_total):
    """x_ref: (TS, TB, H)   wt_ref: (H, H) = W.T (native dtype)
    b_ref: (1, H) f32       o_ref: (TB, H)
    acc_ref: (TB, H) f32 running-sum accumulator (persists across the S axis)."""
    s = pl.program_id(1)
    last_s = pl.num_programs(1) - 1

    @pl.when(s == 0)
    def _init():
        acc_ref[...] = jnp.zeros_like(acc_ref)

    if s_total % ts == 0:
        # Fast path: every S tile is full -> one f32 add per element, nothing else.
        acc_ref[...] += jnp.sum(x_ref[...].astype(jnp.float32), axis=0)
    else:
        # Tail handling compiled only when TS does not divide S, and the mask
        # work runs only on the last S step.
        @pl.when(s != last_s)
        def _full_step():
            acc_ref[...] += jnp.sum(x_ref[...].astype(jnp.float32), axis=0)

        @pl.when(s == last_s)
        def _tail_step():
            # (TS, 1, 1) iota broadcast across (TB, H) instead of a full-slab iota.
            row = jax.lax.broadcasted_iota(jnp.int32, (ts, 1, 1), 0) + s * ts
            x = jnp.where(row < s_total, x_ref[...].astype(jnp.float32), 0.0)
            acc_ref[...] += jnp.sum(x, axis=0)

    @pl.when(s == last_s)
    def _finalize():
        # mean = sum / S : single VPU multiply on the f32 accumulator (exact
        # scale, never folded into a possibly low-precision weight).
        mean = acc_ref[...] * (1.0 / s_total)
        # NOTE: when B % TB != 0 the padded rows of the last B tile carry
        # unspecified data; rows are independent through this matmul and the
        # padded rows are discarded at writeback, so results stay correct.
        out = jnp.dot(mean.astype(wt_ref.dtype), wt_ref[...],
                      preferred_element_type=jnp.float32)
        o_ref[...] = (out + b_ref[...]).astype(o_ref.dtype)


def _round_up(x, m):
    return ((x + m - 1) // m) * m


def _largest_divisor_at_most(n, cap):
    cap = max(1, min(cap, n))
    for d in range(cap, 0, -1):
        if n % d == 0:
            return d
    return 1


def selective_gate_forward(og_logits, enhanced_samples_logits, w_map, b_map,
                           *, tb=None, ts=None, x_tile_bytes=6 * 1024 * 1024):
    """JAX wrapper.

    og_logits:               (B, H)   -- unused by the forward pass (kept for parity)
    enhanced_samples_logits: (S, B, H)
    w_map:                   (H, H)   -- PyTorch nn.Linear weight, shape (out, in)
    b_map:                   (H,)
    returns:                 (B, H)
    """
    del og_logits  # unused in the PyTorch forward as well
    S, B, H = enhanced_samples_logits.shape
    x_dtype = enhanced_samples_logits.dtype
    x_item = jnp.dtype(x_dtype).itemsize
    wt_item = jnp.dtype(w_map.dtype).itemsize
    out_item = x_item

    # Sublane packing multiple for the streamed dtype (8 f32, 16 bf16, 32 int8).
    m = max(8, 32 // x_item)

    # Physical VMEM (per core) for budgeting; conservative fallback (v7x per-TC).
    try:
        vmem_cap = int(pltpu.get_tpu_info().vmem_capacity_bytes)
    except Exception:
        vmem_cap = 64 * 1024 * 1024
    budget_cap = (vmem_cap * 3) // 4
    margin = 2 * 1024 * 1024

    # ---- Batch tile ----------------------------------------------------------
    if tb is None:
        if B <= m:
            tb = B                                   # contiguous, can't split further
        elif B <= 256:
            # Prefer >= 2 B tiles (keeps both v7x TensorCores streaming) as long
            # as each strided DMA segment stays >= ~16 KiB; otherwise keep the
            # fully contiguous full-B slab.
            half = _round_up(pl.cdiv(B, 2), m)
            tb = half if half * H * x_item >= 16 * 1024 else B
        else:
            tb = 256                                 # >= 2 tiles automatically
    else:
        # Validate/round a user-supplied tb to the sublane multiple.
        tb = B if tb >= B else _round_up(int(tb), m)
    tb = int(min(tb, max(B, m)))

    nb = pl.cdiv(B, tb)

    # ---- Fixed VMEM footprint (everything except the streamed x slabs) -------
    fixed_bytes = (2 * H * H * wt_item          # double-buffered W.T (native dtype)
                   + 2 * H * 4                  # bias
                   + 2 * tb * H * out_item      # double-buffered output tile
                   + tb * H * 4)                # f32 accumulator scratch

    per_step_bytes = tb * H * x_item

    # ---- Step (S) tile -------------------------------------------------------
    if ts is None:
        ts = int(max(1, min(S, x_tile_bytes // max(per_step_bytes, 1))))
        avail_for_x = budget_cap - fixed_bytes - margin
        if avail_for_x >= 2 * per_step_bytes:
            ts = max(1, min(ts, avail_for_x // (2 * per_step_bytes)))
        else:
            ts = 1
        # Snap to a divisor of S when one is close -> no tail-mask branch at all.
        d = _largest_divisor_at_most(S, ts)
        if d >= max(1, ts // 2):
            ts = d
    ts = int(min(max(1, ts), S))

    ns = pl.cdiv(S, ts)

    # Explicit scoped-VMEM limit: never below the typical default, never above
    # the physical capacity, always >= what this tiling needs.
    needed = fixed_bytes + 2 * ts * per_step_bytes + margin
    vmem_limit = int(min(vmem_cap, max(needed, 32 * 1024 * 1024)))

    # W.T in its native dtype (no f32 upcast -> half the VMEM + 2x MXU rate for
    # bf16); bias in f32 (tiny, matches the f32 accumulation path).
    wt = w_map.T                                    # (H, H)
    b2 = b_map.astype(jnp.float32).reshape(1, H)    # (1, H)

    kernel = functools.partial(_selective_gate_kernel, ts=ts, s_total=S)

    cost = pl.CostEstimate(
        flops=2 * B * H * H,
        transcendentals=0,
        bytes_accessed=(S * B * H * x_item + H * H * wt_item
                        + B * H * out_item + H * 4),
    )

    return pl.pallas_call(
        kernel,
        out_shape=jax.ShapeDtypeStruct((B, H), x_dtype),
        grid_spec=pltpu.PrefetchScalarGridSpec(
            num_scalar_prefetch=0,
            grid=(nb, ns),                                          # (B tiles, S tiles)
            in_specs=[
                pl.BlockSpec((ts, tb, H), lambda b, s: (s, b, 0)),  # streamed x slab
                pl.BlockSpec((H, H), lambda b, s: (0, 0)),          # W.T (resident)
                pl.BlockSpec((1, H), lambda b, s: (0, 0)),          # bias (resident)
            ],
            out_specs=pl.BlockSpec((tb, H), lambda b, s: (b, 0)),
            scratch_shapes=[pltpu.VMEM((tb, H), jnp.float32)],
        ),
        compiler_params=pltpu.CompilerParams(
            # B axis shards across TensorCores (2 TCs on v7x); S is the reduction.
            dimension_semantics=("parallel", "arbitrary"),
            vmem_limit_bytes=vmem_limit,
        ),
        cost_estimate=cost,
    )(enhanced_samples_logits, wt, b2)


def _reference(enhanced_samples_logits, w_map, b_map):
    mean_rep = jnp.mean(enhanced_samples_logits.astype(jnp.float32), axis=0)
    return mean_rep @ w_map.astype(jnp.float32).T + b_map.astype(jnp.float32)


if __name__ == "__main__":
    key = jax.random.PRNGKey(0)

    # --- Test 1: shapes consistent with the module (step S, batch B, hidden H).
    S, B, H = 8, 8, 128
    k_x, k_og, k_w, k_b, key = jax.random.split(key, 5)
    enhanced = jax.random.normal(k_x, (S, B, H), dtype=jnp.float32)
    og = jax.random.normal(k_og, (B, H), dtype=jnp.float32)
    bound = 1.0 / (H ** 0.5)   # PyTorch nn.Linear default init range
    w_map = jax.random.uniform(k_w, (H, H), minval=-bound, maxval=bound,
                               dtype=jnp.float32)
    b_map = jax.random.uniform(k_b, (H,), minval=-bound, maxval=bound,
                               dtype=jnp.float32)
    # TODO(synk): the selectiveGate MLP (Linear(H,512)->ReLU->Linear(512,1)->Sigmoid)
    # is initialized in the PyTorch __init__ but never used in forward, so it is
    # intentionally omitted.

    out = jax.block_until_ready(selective_gate_forward(og, enhanced, w_map, b_map))
    ref = _reference(enhanced, w_map, b_map)
    assert out.shape == (B, H)
    assert jnp.allclose(out, ref, atol=1e-4, rtol=1e-4), "test1 mismatch vs reference"

    # --- Test 2: exercise the multi-tile pipeline, the S-tail mask path
    # (S % TS != 0, masked only on the last S step) and an uneven B tail
    # (B % TB != 0, padded rows discarded at writeback).
    S2, B2, H2 = 20, 24, 256
    k_x2, k_og2, k_w2, k_b2, key = jax.random.split(key, 5)
    enhanced2 = jax.random.normal(k_x2, (S2, B2, H2), dtype=jnp.float32)
    og2 = jax.random.normal(k_og2, (B2, H2), dtype=jnp.float32)
    bound2 = 1.0 / (H2 ** 0.5)
    w_map2 = jax.random.uniform(k_w2, (H2, H2), minval=-bound2, maxval=bound2,
                                dtype=jnp.float32)
    b_map2 = jax.random.uniform(k_b2, (H2,), minval=-bound2, maxval=bound2,
                                dtype=jnp.float32)

    out2 = jax.block_until_ready(
        selective_gate_forward(og2, enhanced2, w_map2, b_map2, tb=16, ts=8))
    ref2 = _reference(enhanced2, w_map2, b_map2)
    assert out2.shape == (B2, H2)
    assert jnp.allclose(out2, ref2, atol=1e-4, rtol=1e-4), "test2 mismatch vs reference"

    # --- Test 3: default tiling heuristics on a larger-B case (nb >= 2 path).
    S3, B3, H3 = 6, 160, 128
    k_x3, k_og3, k_w3, k_b3, key = jax.random.split(key, 5)
    enhanced3 = jax.random.normal(k_x3, (S3, B3, H3), dtype=jnp.float32)
    og3 = jax.random.normal(k_og3, (B3, H3), dtype=jnp.float32)
    bound3 = 1.0 / (H3 ** 0.5)
    w_map3 = jax.random.uniform(k_w3, (H3, H3), minval=-bound3, maxval=bound3,
                                dtype=jnp.float32)
    b_map3 = jax.random.uniform(k_b3, (H3,), minval=-bound3, maxval=bound3,
                                dtype=jnp.float32)

    out3 = jax.block_until_ready(
        selective_gate_forward(og3, enhanced3, w_map3, b_map3))
    ref3 = _reference(enhanced3, w_map3, b_map3)
    assert out3.shape == (B3, H3)
    assert jnp.allclose(out3, ref3, atol=1e-4, rtol=1e-4), "test3 mismatch vs reference"

    print("KERNEL_OK")
</pallas_src>

<mosaic_0001>
module attributes {stable_mosaic.version = 11 : i64} {
  func.func @_selective_gate_kernel(%arg0: i32, %arg1: i32, %arg2: memref<8x8x128xf32, #tpu.memory_space<vmem>>, %arg3: memref<128x128xf32, #tpu.memory_space<vmem>>, %arg4: memref<1x128xf32, #tpu.memory_space<vmem>>, %arg5: memref<8x128xf32, #tpu.memory_space<vmem>>, %arg6: memref<8x128xf32, #tpu.memory_space<vmem>>) attributes {dimension_semantics = [#tpu.dimension_semantics<parallel>, #tpu.dimension_semantics<arbitrary>], iteration_bounds = array<i64: 1, 1>, scalar_prefetch = 0 : i64, scratch_operands = 1 : i64, tpu.core_type = #tpu.core_type<tc>, window_params = [{transform_indices = @transform_0, window_bounds = array<i64: 8, 8, 128>}, {pipeline_mode = #tpu.pipeline_mode<synchronous>, transform_indices = @transform_1, window_bounds = array<i64: 128, 128>}, {pipeline_mode = #tpu.pipeline_mode<synchronous>, transform_indices = @transform_2, window_bounds = array<i64: 1, 128>}, {transform_indices = @transform_3, window_bounds = array<i64: 8, 128>}]} {
    %c0_i32 = arith.constant 0 : i32
    %0 = arith.cmpi eq, %arg1, %c0_i32 : i32
    %1 = arith.extui %0 : i1 to i32
    %c0_i32_0 = arith.constant 0 : i32
    %2 = arith.cmpi ne, %1, %c0_i32_0 : i32
    scf.if %2 {
      %cst_9 = arith.constant 0.000000e+00 : f32
      %11 = vector.broadcast %cst_9 : f32 to vector<8x128xf32>
      %c0_10 = arith.constant 0 : index
      %c0_11 = arith.constant 0 : index
      %12 = vector.load %arg6[%c0_10, %c0_11] : memref<8x128xf32, #tpu.memory_space<vmem>>, vector<8x128xf32>
      tpu.vector_store %arg6[%c0_10, %c0_11], %11 {strides = array<i32>} : memref<8x128xf32, #tpu.memory_space<vmem>>, vector<8x128xf32>,
    } else {
    }
    %c0 = arith.constant 0 : index
    %c0_1 = arith.constant 0 : index
    %3 = vector.load %arg6[%c0, %c0_1] : memref<8x128xf32, #tpu.memory_space<vmem>>, vector<8x128xf32>
    %c0_2 = arith.constant 0 : index
    %c0_3 = arith.constant 0 : index
    %c0_4 = arith.constant 0 : index
    %4 = vector.load %arg2[%c0_2, %c0_3, %c0_4] : memref<8x8x128xf32, #tpu.memory_space<vmem>>, vector<8x8x128xf32>
    %cst = arith.constant dense<0.000000e+00> : vector<8x128xf32>
    %5 = vector.multi_reduction <add>, %4, %cst [0] : vector<8x8x128xf32> to vector<8x128xf32>
    %6 = arith.addf %3, %5 : vector<8x128xf32>
    %c0_5 = arith.constant 0 : index
    %c0_6 = arith.constant 0 : index
    %7 = vector.load %arg6[%c0_5, %c0_6] : memref<8x128xf32, #tpu.memory_space<vmem>>, vector<8x128xf32>
    tpu.vector_store %arg6[%c0_5, %c0_6], %6 {strides = array<i32>} : memref<8x128xf32, #tpu.memory_space<vmem>>, vector<8x128xf32>,
    %c0_i32_7 = arith.constant 0 : i32
    %8 = arith.cmpi eq, %arg1, %c0_i32_7 : i32
    %9 = arith.extui %8 : i1 to i32
    %c0_i32_8 = arith.constant 0 : i32
    %10 = arith.cmpi ne, %9, %c0_i32_8 : i32
    scf.if %10 {
      %c0_9 = arith.constant 0 : index
      %c0_10 = arith.constant 0 : index
      %11 = vector.load %arg6[%c0_9, %c0_10] : memref<8x128xf32, #tpu.memory_space<vmem>>, vector<8x128xf32>
      %cst_11 = arith.constant 1.250000e-01 : f32
      %12 = vector.broadcast %cst_11 : f32 to vector<8x128xf32>
      %13 = arith.mulf %11, %12 : vector<8x128xf32>
      %c0_12 = arith.constant 0 : index
      %c0_13 = arith.constant 0 : index
      %14 = vector.load %arg3[%c0_12, %c0_13] : memref<128x128xf32, #tpu.memory_space<vmem>>, vector<128x128xf32>
      %cst_14 = arith.constant dense<0.000000e+00> : vector<8x128xf32>
      %15 = tpu.matmul %13, %14, %cst_14 {dimension_numbers = #tpu.dot_dimension_numbers<[1], [0], [0], [1], [0, 0, 1, 1], [], []>} : vector<8x128xf32>, vector<128x128xf32>, vector<8x128xf32> -> vector<8x128xf32>
      %c0_15 = arith.constant 0 : index
      %c0_16 = arith.constant 0 : index
      %16 = vector.load %arg4[%c0_15, %c0_16] : memref<1x128xf32, #tpu.memory_space<vmem>>, vector<1x128xf32>
      %17 = vector.broadcast %16 : vector<1x128xf32> to vector<8x128xf32>
      %18 = arith.addf %15, %17 : vector<8x128xf32>
      %c0_17 = arith.constant 0 : index
      %c0_18 = arith.constant 0 : index
      %19 = vector.load %arg5[%c0_17, %c0_18] : memref<8x128xf32, #tpu.memory_space<vmem>>, vector<8x128xf32>
      tpu.vector_store %arg5[%c0_17, %c0_18], %18 {strides = array<i32>} : memref<8x128xf32, #tpu.memory_space<vmem>>, vector<8x128xf32>,
    } else {
    }
    return
  }
  func.func @transform_0(%arg0: i32, %arg1: i32) -> (i32, i32, i32) {
    %c0_i32 = arith.constant 0 : i32
    %c0_i32_0 = arith.constant 0 : i32
    return %arg1, %arg0, %c0_i32 : i32, i32, i32
  }
  func.func @transform_1(%arg0: i32, %arg1: i32) -> (i32, i32) {
    %c0_i32 = arith.constant 0 : i32
    %c0_i32_0 = arith.constant 0 : i32
    %c0_i32_1 = arith.constant 0 : i32
    return %c0_i32, %c0_i32_0 : i32, i32
  }
  func.func @transform_2(%arg0: i32, %arg1: i32) -> (i32, i32) {
    %c0_i32 = arith.constant 0 : i32
    %c0_i32_0 = arith.constant 0 : i32
    %c0_i32_1 = arith.constant 0 : i32
    return %c0_i32, %c0_i32_0 : i32, i32
  }
  func.func @transform_3(%arg0: i32, %arg1: i32) -> (i32, i32) {
    %c0_i32 = arith.constant 0 : i32
    %c0_i32_0 = arith.constant 0 : i32
    return %arg0, %c0_i32 : i32, i32
  }
}

</mosaic_0001>

<bundles_post_ra>
// kernel: tpu_custom_call.1
= control target key start
LH: loop header
LB: loop body
LE: loop exit
PB: predicated region body
PF: predicated region fallthrough
CT: control target
= control target key end

     0   :  { %8 = vsyncpa [#allocation4], 0  ;;  %s405_s0 = inlined_call_operand.hbm [shape: f32[8,8,128], index: 0, kind: input, shape index: {}]   ;;  %s406_s1 = inlined_call_operand.hbm [shape: f32[128,128], index: 1, kind: input, shape index: {}]   ;;  %s407_s2 = inlined_call_operand.vmem [shape: f32[1,128], index: 2, kind: input, shape index: {}]   ;;  %s408_s3 = inlined_call_operand.hbm [shape: f32[8,128], index: 3, kind: output, shape index: {}]  }
   0x1   :  { %9 = vsyncpa [#allocation7], 0 }
   0x2   :  { %10 = vsyncpa [#allocation5], 0  ;;  %s338_s12 = smov [#allocation3]   ;;  %s266_s16 = scalar_lea.hbm %s405_s0, 1024 }
   0x3   :  { %s16_s13 = sshll.u32 %s338_s12, 4  ;;  %p267_p0 = scmp.ne.s32.totalorder %s405_s0, %s266_s16  ;;  %s17_s13 = int_to_ptr.vmem [resolvable:$true] %s16_s13 }
   0x4   :  { %p270_p1 = scmp.lt.u32.totalorder %s266_s16, %s405_s0 }
   0x6   :  { %p272_p2 = pnand %p270_p1, %p267_p0 }
   0x8   :  { %275 = shalt.err (!%p272_p2)
}
   0x9   :  { %s276_s21 = scalar_lea.vmem %s17_s13, 1024  ;;  %p281_p4 = scmp.lt.s32.totalorder %s17_s13, %s17_s13 }
   0xa   :  { %p277_p3 = scmp.ne.s32.totalorder %s17_s13, %s276_s21  ;;  %p282_p5 = scmp.lt.s32.totalorder %s276_s21, %s276_s21 }
   0xc   :  { %p283_p6 = por %p282_p5, %p281_p4 }
   0xe   :  { %p284_p7 = pnand %p283_p6, %p277_p3 }
  0x10   :  { %287 = shalt.err (!%p284_p7)
}
  0x11   :  { %s339_s22 = smov 128   ;;  %s340_s23 = smov 8  }
  0x12   :  { %22 = dma.hbm_to_vmem [thread:$0]  %s405_s0, 1024, %s17_s13, [#allocation4], %s339_s22, %s339_s22, %s340_s23  }
  0x13   :  { %s341_s26 = smov [#allocation6]   ;;  %s288_s30 = scalar_lea.hbm %s406_s1, 2048 }
  0x14   :  { %s28_s27 = sshll.u32 %s341_s26, 4  ;;  %p289_p8 = scmp.ne.s32.totalorder %s406_s1, %s288_s30  ;;  %s29_s27 = int_to_ptr.vmem [resolvable:$true] %s28_s27 }
  0x15   :  { %p292_p9 = scmp.lt.u32.totalorder %s288_s30, %s406_s1 }
  0x17   :  { %p294_p10 = pnand %p292_p9, %p289_p8 }
  0x19   :  { %297 = shalt.err (!%p294_p10)
}
  0x1a   :  { %s298_s8 = scalar_lea.vmem %s29_s27, 2048  ;;  %p303_p12 = scmp.lt.s32.totalorder %s29_s27, %s29_s27 }
  0x1b   :  { %p299_p11 = scmp.ne.s32.totalorder %s29_s27, %s298_s8  ;;  %p304_p13 = scmp.lt.s32.totalorder %s298_s8, %s298_s8 }
  0x1d   :  { %p305_p0 = por %p304_p13, %p303_p12 }
  0x1f   :  { %p306_p1 = pnand %p305_p0, %p299_p11 }
  0x21   :  { %309 = shalt.err (!%p306_p1)
}
  0x22   :  { %34 = dma.hbm_to_vmem [thread:$0]  %s406_s1, 2048, %s29_s27, [#allocation7], %s339_s22, %s339_s22, %s340_s23  }
  0x23   :  { %332 = dma.done.wait [#allocation4], 1024  }
  0x24   :  { %333 = vsyncadd [#allocation4], 4294966272 }
  0x25   :  { %334 = dma.done.wait [#allocation7], 2048  }
  0x26   :  { %335 = vsyncadd [#allocation7], 4294965248  ;;  %v342_v0 = vmov 0.0|0.0   ;;  %vm343_vm0 = vmmov 0   ;;  %v344_v1 = vmov 0.0   ;;  %v71_v2 = vld [vmem:[#allocation6] sm:$0xff] }
  0x27   :  { %234 = vmatprep.subr.bf16.mxu0 %v342_v0  ;;  %231 = vmatprep.mubr.msk.f32.mxu0 %vm343_vm0, %v344_v1  ;;  %v72_v3 = vld [vmem:[#allocation6 + $0x8] sm:$0xff]  ;;  %v73_v4 = vld [vmem:[#allocation6 + $0x10] sm:$0xff]  ;;  %v74_v6 = vld [vmem:[#allocation6 + $0x18] sm:$0xff]  ;;  %s345_s11 = smov [#allocation8]  }
  0x28   :  { %v235_v5 = vpack.c.bf16 %v72_v3, %v71_v2  ;;  %v238_v7 = vpack.c.bf16 %v74_v6, %v73_v4  ;;  %v75_v8 = vld [vmem:[#allocation6 + $0x20] sm:$0xff]  ;;  %v76_v9 = vld [vmem:[#allocation6 + $0x28] sm:$0xff]  ;;  %v51_v12 = vld [vmem:[#allocation3 + $0x10] sm:$0xff]  ;;  %s171_s12 = sshll.u32 %s345_s11, 4  ;;  %s172_s12 = int_to_ptr.vmem [resolvable:$true] %s171_s12 }
  0x29   :  { %v49_v10 = vld [vmem:[#allocation3] sm:$0xff]  ;;  %v50_v11 = vld [vmem:[#allocation3 + $0x8] sm:$0xff]  ;;  %v241_v14 = vpack.c.bf16 %v76_v9, %v75_v8  ;;  %v52_v15 = vld [vmem:[#allocation3 + $0x18] sm:$0xff]  ;;  %s310_s13 = scalar_lea.vmem %s172_s12, 128  ;;  %p315_p3 = scmp.lt.s32.totalorder %s172_s12, %s172_s12 }
  0x2a   :  { %236 = vmatpush3.bf16.msra.mxu0 %v235_v5  ;;  %v57_v13 = vadd.f32 %v50_v11, %v49_v10  ;;  %v77_v16 = vld [vmem:[#allocation6 + $0x30] sm:$0xff]  ;;  %v78_v17 = vld [vmem:[#allocation6 + $0x38] sm:$0xff]  ;;  %v53_v21 = vld [vmem:[#allocation3 + $0x20] sm:$0xff]  ;;  %p311_p2 = scmp.ne.s32.totalorder %s172_s12, %s310_s13  ;;  %p316_p4 = scmp.lt.s32.totalorder %s310_s13, %s310_s13 }
  0x2b   :  { %237 = vmatprep.subr.bf16.mxu0 %v342_v0  ;;  %v244_v20 = vpack.c.bf16 %v78_v17, %v77_v16  ;;  %v79_v22 = vld [vmem:[#allocation6 + $0x40] sm:$0xff]  ;;  %v80_v23 = vld [vmem:[#allocation6 + $0x48] sm:$0xff]  ;;  %v81_v27 = vld [vmem:[#allocation6 + $0x50] sm:$0xff] }
  0x2c   :  { %v58_v18 = vadd.f32 %v57_v13, %v51_v12  ;;  %v247_v25 = vpack.c.bf16 %v80_v23, %v79_v22  ;;  %v54_v26 = vld [vmem:[#allocation3 + $0x28] sm:$0xff]  ;;  %v82_v28 = vld [vmem:[#allocation6 + $0x58] sm:$0xff]  ;;  %v55_v31 = vld [vmem:[#allocation3 + $0x30] sm:$0xff]  ;;  %p317_p5 = por %p316_p4, %p315_p3 }
  0x2d   :  { %v250_v30 = vpack.c.bf16 %v82_v28, %v81_v27  ;;  %v83_v32 = vld [vmem:[#allocation6 + $0x60] sm:$0xff]  ;;  %v84_v33 = vld [vmem:[#allocation6 + $0x68] sm:$0xff]  ;;  %v56_v36 = vld [vmem:[#allocation3 + $0x38] sm:$0xff] }
  0x2e   :  { %239 = vmatpush3.bf16.msra.mxu0 %v238_v7  ;;  %v59_v19 = vadd.f32 %v58_v18, %v52_v15  ;;  %v253_v35 = vpack.c.bf16 %v84_v33, %v83_v32  ;;  %v85_v37 = vld [vmem:[#allocation6 + $0x70] sm:$0xff]  ;;  %v86_v38 = vld [vmem:[#allocation6 + $0x78] sm:$0xff]  ;;  %v181_v42 = vld [vmem:[%s407_s2] ss:$0 sm:$0xff]  ;;  %p318_p6 = pnand %p317_p5, %p311_p2 }
  0x2f   :  { %240 = vmatprep.subr.bf16.mxu0 %v342_v0  ;;  %v256_v40 = vpack.c.bf16 %v86_v38, %v85_v37 }
  0x30   :  { %v60_v24 = vadd.f32 %v59_v19, %v53_v21 }
  0x32   :  { %242 = vmatpush3.bf16.msra.mxu0 %v241_v14  ;;  %v61_v29 = vadd.f32 %v60_v24, %v54_v26 }
  0x33   :  { %243 = vmatprep.subr.bf16.mxu0 %v342_v0 }
  0x34   :  { %v62_v34 = vadd.f32 %v61_v29, %v55_v31 }
  0x36   :  { %245 = vmatpush3.bf16.msra.mxu0 %v244_v20  ;;  %v63_v39 = vadd.f32 %v62_v34, %v56_v36 }
  0x37   :  { %246 = vmatprep.subr.bf16.mxu0 %v342_v0 }
  0x38   :  { %v70_v41 = vmul.f32 0.125, %v63_v39 }
  0x3a   :  { %248 = vmatpush3.bf16.msra.mxu0 %v247_v25 }
  0x3b   :  { %249 = vmatprep.subr.bf16.mxu0 %v342_v0 }
  0x3e   :  { %251 = vmatpush3.bf16.msra.mxu0 %v250_v30 }
  0x3f   :  { %252 = vmatprep.subr.bf16.mxu0 %v342_v0 }
  0x42   :  { %254 = vmatpush3.bf16.msra.mxu0 %v253_v35 }
  0x43   :  { %255 = vmatprep.subr.bf16.mxu0 %v342_v0 }
  0x46   :  { %257 = vmatpush3.bf16.msra.mxu0 %v256_v40 }
  0x49   :  { %232 = vmatmul.mubr.f32.vlgmr.msra.gmra.mrb[0].mxu0 %v70_v41 }
 0x11c   :  { %v160_v43 = vpop.f32.mrb[0].mxu0 }
 0x11d   :  { %v161_v44 = vadd.f32 %v181_v42, %v160_v43  ;;  %v233_v45 = vpop.f32.mrb[1].mxu0 }
 0x11f   :  { %164 = vst [vmem:[#allocation8] sm:$0xff] %v161_v44 }
 0x120   :  { %321 = shalt.err (!%p318_p6)
}
 0x121   :  { %s322_s16 = scalar_lea.hbm %s408_s3, 128 }
 0x122   :  { %p323_p7 = scmp.ne.s32.totalorder %s408_s3, %s322_s16  ;;  %p326_p8 = scmp.lt.u32.totalorder %s322_s16, %s408_s3 }
 0x124   :  { %p328_p9 = pnand %p326_p8, %p323_p7 }
 0x126   :  { %331 = shalt.err (!%p328_p9)
}
 0x127   :  { %174 = dma.vmem_to_hbm [thread:$0]  %s172_s12, 128, %s408_s3, [#allocation5]  }
 0x128   :  { %336 = dma.done.wait [#allocation5], 128  }
 0x129   :  { %337 = vsyncadd [#allocation5], 4294967168 }
 0x12a   :  { %178 = vsyncpa [#allocation4], 1 }
 0x12b   :  { %179 = vsyncpa [#allocation7], 1 }
 0x12c   :  { %180 = vsyncpa [#allocation5], 1 }

</bundles_post_ra>
